<compile_context>
chip_gen: v5e
topology: v5e:2x2
jax: 0.10.0
libtpu: 0.0.40
codegen_flags: <defaults>
</compile_context>

<pallas_src>
import functools

import jax
import jax.numpy as jnp
import numpy as np
from jax.experimental import pallas as pl
from jax.experimental.pallas import tpu as pltpu

_BLOCK_TARGET_BYTES = 12 * 1024 * 1024   # combined (in + out + f32 temps) per grid step
_VMEM_CEILING = 56 * 1024 * 1024         # stay under v7x's 64 MiB/TC physical VMEM


# ----------------------------------------------------------------------------
# Host-side helpers (deterministic, parameter-free "weights")
# ----------------------------------------------------------------------------
def _round_up(x: int, m: int) -> int:
    return ((int(x) + m - 1) // m) * m


def _sublane_multiple(dtype) -> int:
    # 8 rows for 4-byte dtypes, 16 for bf16/f16, 32 for int8/fp8.
    return max(8, 32 // max(jnp.dtype(dtype).itemsize, 1))


def _padded_lanes(n: int) -> int:
    return _round_up(max(int(n), 1), 128)


def _adaptive_pool_matrix(in_size: int, out_size: int) -> np.ndarray:
    """P[o, i] = 1/|window_o| if i is in PyTorch's adaptive window o, else 0."""
    P = np.zeros((out_size, in_size), dtype=np.float32)
    for o in range(out_size):
        start = (o * in_size) // out_size
        end = -((-(o + 1) * in_size) // out_size)  # ceil((o+1)*in/out)
        P[o, start:end] = 1.0 / float(end - start)
    return P


def _block_rows_and_vmem(total_rows: int, in_lanes: int, out_lanes: int, dtype,
                         weight_bytes: int,
                         target_bytes: int = _BLOCK_TARGET_BYTES):
    """Rows per grid step + vmem_limit derived from the actual buffer sizes.

    VMEM is budgeted with the *lane-padded* row widths (what the compiler
    really allocates), plus an allowance for per-row f32 temporaries.
    """
    itemsize = max(jnp.dtype(dtype).itemsize, 1)
    mult = _sublane_multiple(dtype)
    row_bytes = ((_padded_lanes(in_lanes) + _padded_lanes(out_lanes)) * itemsize
                 + 2 * 128 * 4)                    # + f32 temps (xh / m / staging)
    r = max(mult, (int(target_bytes // row_bytes) // mult) * mult)
    if total_rows > mult:
        # Keep >= 2 grid steps so dimension_semantics=("parallel",) can shard
        # across v7x's two TensorCores (harmless on single-TC v5e/v6e).
        r = min(r, _round_up(pl.cdiv(total_rows, 2), mult))
    if r >= total_rows:
        r = int(total_rows)
    vmem = 2 * r * row_bytes + 2 * int(weight_bytes) + (4 << 20)
    vmem = int(min(_VMEM_CEILING, max(vmem, 16 << 20)))
    return r, vmem


# ----------------------------------------------------------------------------
# Pallas kernels
# ----------------------------------------------------------------------------
def _avg_pool_general_kernel(x_ref, kt_ref, o_ref):
    # x: (bc, H*W)   kt: (H*W, Lp)   o: (bc, Lp)   with Lp = pad128(tH*tW).
    o_ref[...] = jnp.dot(x_ref[...], kt_ref[...],
                         preferred_element_type=jnp.float32).astype(o_ref.dtype)


def _avg_pool_div_kernel(x_ref, s_ref, o_ref, *, w, kh):
    # x: (br, kH*W)   s: (W, tWp) with 1/(kH*kW) window weights   o: (br, tWp).
    # Partial tail blocks compute on padded rows; their stores are masked.
    x = x_ref[...]
    xh = x[:, :w].astype(jnp.float32)
    for i in range(1, kh):                          # VPU adds over the H window
        xh = xh + x[:, i * w:(i + 1) * w].astype(jnp.float32)
    o_ref[...] = jnp.dot(xh, s_ref[...],            # one lane-dense MXU matmul
                         preferred_element_type=jnp.float32).astype(o_ref.dtype)


def _max_pool_div_kernel(x_ref, s_ref, o_ref, *, w, kh, kw):
    # x: (br, kH*W)   s: (W-kW+1, tWp) 0/1 compaction matrix   o: (br, tWp).
    # Window max over all kH*kW offsets via static lane slices + VPU maxima,
    # then ONE selection matmul to compact the stride-kW columns lane-densely.
    # NOTE: a NaN/Inf anywhere in a row contaminates that row's outputs
    # (0*Inf = NaN), unlike a true windowed max.  Partial tail blocks compute
    # on padded rows; their stores are masked.
    x = x_ref[...]
    span = w - kw + 1
    m = x[:, :span]
    for i in range(kh):
        for j in range(kw):
            if i == 0 and j == 0:
                continue
            d = i * w + j
            m = jnp.maximum(m, x[:, d:d + span])
    o_ref[...] = jnp.dot(m.astype(jnp.float32), s_ref[...],
                         preferred_element_type=jnp.float32).astype(o_ref.dtype)


# ----------------------------------------------------------------------------
# Wrappers around pallas_call
# ----------------------------------------------------------------------------
def _avg_divisible(x: jnp.ndarray, tH: int, tW: int) -> jnp.ndarray:
    N, C, H, W = x.shape
    kH, kW = H // tH, W // tW
    R = N * C * tH
    in_lanes = kH * W
    tWp = _padded_lanes(tW)

    s_np = np.zeros((W, tWp), dtype=np.float32)
    inv = 1.0 / float(kH * kW)
    for o in range(tW):
        s_np[o * kW:(o + 1) * kW, o] = inv
    s = jnp.asarray(s_np)                          # keep f32: exact 1/|window|

    xf = x.reshape(R, in_lanes)                    # zero-copy view
    weight_bytes = _round_up(W, 8) * tWp * 4
    br, vmem = _block_rows_and_vmem(R, in_lanes, tWp, x.dtype, weight_bytes)
    grid = (pl.cdiv(R, br),)

    itemsize = x.dtype.itemsize
    cost = pl.CostEstimate(
        flops=int(R * (kH - 1) * W + 2 * R * W * tWp),
        transcendentals=0,
        bytes_accessed=int(R * in_lanes * itemsize + weight_bytes + R * tWp * itemsize),
    )

    out = pl.pallas_call(
        functools.partial(_avg_pool_div_kernel, w=W, kh=kH),
        out_shape=jax.ShapeDtypeStruct((R, tWp), x.dtype),
        grid_spec=pltpu.PrefetchScalarGridSpec(
            num_scalar_prefetch=0,
            grid=grid,
            in_specs=[
                pl.BlockSpec((br, in_lanes), lambda b: (b, 0)),
                pl.BlockSpec((W, tWp), lambda b: (0, 0)),
            ],
            out_specs=pl.BlockSpec((br, tWp), lambda b: (b, 0)),
        ),
        compiler_params=pltpu.CompilerParams(
            dimension_semantics=("parallel",),
            vmem_limit_bytes=vmem,
        ),
        cost_estimate=cost,
    )(xf, s)
    return out[:, :tW].reshape(N, C, tH, tW)


def _avg_general(x: jnp.ndarray, tH: int, tW: int) -> jnp.ndarray:
    N, C, H, W = x.shape
    HW = H * W
    L = tH * tW
    Lp = _padded_lanes(L)
    NC = N * C

    # TODO(synk): the general (non-divisible / upsampling) path keeps the full
    # kron pooling matrix (H*W, Lp) resident in VMEM; fine for the small
    # non-divisible cases it serves, not for very large H*W.
    kt_np = np.zeros((HW, Lp), dtype=np.float32)
    kt_np[:, :L] = np.kron(_adaptive_pool_matrix(H, tH),
                           _adaptive_pool_matrix(W, tW)).T
    kt = jnp.asarray(kt_np)                        # keep f32: exact weights

    xf = x.reshape(NC, HW)                         # zero-copy view
    weight_bytes = _round_up(HW, 8) * Lp * 4
    bc, vmem = _block_rows_and_vmem(NC, HW, Lp, x.dtype, weight_bytes)
    grid = (pl.cdiv(NC, bc),)

    itemsize = x.dtype.itemsize
    cost = pl.CostEstimate(
        flops=int(2 * NC * HW * Lp),
        transcendentals=0,
        bytes_accessed=int(NC * HW * itemsize + weight_bytes + NC * Lp * itemsize),
    )

    out = pl.pallas_call(
        _avg_pool_general_kernel,
        out_shape=jax.ShapeDtypeStruct((NC, Lp), x.dtype),
        grid_spec=pltpu.PrefetchScalarGridSpec(
            num_scalar_prefetch=0,
            grid=grid,
            in_specs=[
                pl.BlockSpec((bc, HW), lambda b: (b, 0)),
                pl.BlockSpec((HW, Lp), lambda b: (0, 0)),
            ],
            out_specs=pl.BlockSpec((bc, Lp), lambda b: (b, 0)),
        ),
        compiler_params=pltpu.CompilerParams(
            dimension_semantics=("parallel",),
            vmem_limit_bytes=vmem,
        ),
        cost_estimate=cost,
    )(xf, kt)
    return out[:, :L].reshape(N, C, tH, tW)


def adaptive_avg_pool2d_pallas(x: jnp.ndarray, target_size) -> jnp.ndarray:
    N, C, H, W = x.shape
    tH, tW = target_size
    if (tH, tW) == (H, W):
        return x                                   # adaptive pool to same size == identity
    if H % tH == 0 and W % tW == 0 and H >= tH and W >= tW:
        return _avg_divisible(x, tH, tW)
    return _avg_general(x, tH, tW)


def adaptive_max_pool2d_pallas(x: jnp.ndarray, target_size) -> jnp.ndarray:
    N, C, H, W = x.shape
    tH, tW = target_size
    if (tH, tW) == (H, W):
        return x
    # TODO(synk): general (non-divisible / upsampling) adaptive MAX pooling not
    # implemented; only evenly divisible downsampling is supported here.
    assert H % tH == 0 and W % tW == 0 and H >= tH and W >= tW, \
        "max pool path requires evenly divisible downsampling"
    kH, kW = H // tH, W // tW
    R = N * C * tH
    in_lanes = kH * W
    span = W - kW + 1
    tWp = _padded_lanes(tW)

    s_np = np.zeros((span, tWp), dtype=np.float32)
    for o in range(tW):
        s_np[o * kW, o] = 1.0
    s = jnp.asarray(s_np)

    xf = x.reshape(R, in_lanes)                    # zero-copy view
    weight_bytes = _round_up(span, 8) * tWp * 4
    br, vmem = _block_rows_and_vmem(R, in_lanes, tWp, x.dtype, weight_bytes)
    grid = (pl.cdiv(R, br),)

    itemsize = x.dtype.itemsize
    cost = pl.CostEstimate(
        flops=int(R * (kH * kW - 1) * span + 2 * R * span * tWp),
        transcendentals=0,
        bytes_accessed=int(R * in_lanes * itemsize + weight_bytes + R * tWp * itemsize),
    )

    out = pl.pallas_call(
        functools.partial(_max_pool_div_kernel, w=W, kh=kH, kw=kW),
        out_shape=jax.ShapeDtypeStruct((R, tWp), x.dtype),
        grid_spec=pltpu.PrefetchScalarGridSpec(
            num_scalar_prefetch=0,
            grid=grid,
            in_specs=[
                pl.BlockSpec((br, in_lanes), lambda b: (b, 0)),
                pl.BlockSpec((span, tWp), lambda b: (0, 0)),
            ],
            out_specs=pl.BlockSpec((br, tWp), lambda b: (b, 0)),
        ),
        compiler_params=pltpu.CompilerParams(
            dimension_semantics=("parallel",),
            vmem_limit_bytes=vmem,
        ),
        cost_estimate=cost,
    )(xf, s)
    return out[:, :tW].reshape(N, C, tH, tW)


# ----------------------------------------------------------------------------
# Module-equivalent wrapper
# ----------------------------------------------------------------------------
class ResizeAndConcatenate:
    POOL_MODE_MAPPING = {"avg": "avg", "average": "avg", "mean": "avg", "max": "max"}

    def __init__(self, target_size, pool_mode="average"):
        assert pool_mode in self.POOL_MODE_MAPPING, pool_mode
        self.target_size = target_size
        self.pool_mode = self.POOL_MODE_MAPPING[pool_mode]

    def __call__(self, *inputs):
        dim = inputs[0].ndim
        assert dim == 4, "only 4D (NCHW) inputs supported here"
        # TODO(synk): 5D (NCDHW) path with adaptive_{avg,max}_pool3d not implemented.
        ts = (
            tuple(self.target_size)
            if isinstance(self.target_size, (tuple, list))
            else (self.target_size,) * 2
        )
        pool = (
            adaptive_avg_pool2d_pallas
            if self.pool_mode == "avg"
            else adaptive_max_pool2d_pallas
        )
        resized = []
        for i, x in enumerate(inputs):
            assert x.ndim == dim, f"inputs[{i}] must be {dim}D"
            resized.append(pool(x, ts))
        # TODO(synk): fuse this concat by writing each pooled result into its
        # channel slice of a shared buffer (out_specs channel offset +
        # input_output_aliases) to skip one HBM round trip of the outputs.
        return jnp.concatenate(resized, axis=1)


# ----------------------------------------------------------------------------
# Pure-JAX references (for correctness check only)
# ----------------------------------------------------------------------------
def _ref_adaptive_avg(x, ts):
    tH, tW = ts
    N, C, H, W = x.shape
    if H % tH == 0 and W % tW == 0 and H >= tH and W >= tW:
        return x.reshape(N, C, tH, H // tH, tW, W // tW).astype(jnp.float32) \
                .mean(axis=(3, 5)).astype(x.dtype)
    ph = jnp.asarray(_adaptive_pool_matrix(H, tH))
    pw = jnp.asarray(_adaptive_pool_matrix(W, tW))
    return jnp.einsum("oh,nchw,pw->ncop", ph, x.astype(jnp.float32), pw,
                      precision=jax.lax.Precision.HIGHEST).astype(x.dtype)


def _ref_adaptive_max(x, ts):
    N, C, H, W = x.shape
    tH, tW = ts
    kH, kW = H // tH, W // tW
    return x.reshape(N, C, tH, kH, tW, kW).max(axis=(3, 5))


if __name__ == "__main__":
    key = jax.random.PRNGKey(0)
    k1, k2, k3 = jax.random.split(key, 3)

    # Three inputs with different channel counts and spatial sizes.
    x1 = jax.random.normal(k1, (2, 4, 16, 16), dtype=jnp.float32)  # downsample
    x2 = jax.random.normal(k2, (2, 3, 8, 8), dtype=jnp.float32)    # identity size
    x3 = jax.random.normal(k3, (2, 2, 4, 4), dtype=jnp.float32)    # upsample

    target = 8

    # --- average pooling mode (module default) ---
    mod_avg = ResizeAndConcatenate(target_size=target, pool_mode="average")
    out_avg = jax.block_until_ready(mod_avg(x1, x2, x3))
    ref_avg = jnp.concatenate(
        [_ref_adaptive_avg(x, (target, target)) for x in (x1, x2, x3)], axis=1
    )
    assert out_avg.shape == (2, 9, 8, 8), out_avg.shape
    assert jnp.allclose(out_avg, ref_avg, atol=1e-5, rtol=1e-5)

    # --- max pooling mode (divisible case) ---
    mod_max = ResizeAndConcatenate(target_size=target, pool_mode="max")
    out_max = jax.block_until_ready(mod_max(x1, x2))
    ref_max = jnp.concatenate(
        [_ref_adaptive_max(x, (target, target)) for x in (x1, x2)], axis=1
    )
    assert out_max.shape == (2, 7, 8, 8), out_max.shape
    assert jnp.allclose(out_max, ref_max)

    print("KERNEL_OK")
</pallas_src>

<mosaic_0001>
module attributes {stable_mosaic.version = 11 : i64} {
  func.func @_avg_pool_div_kernel(%arg0: i32, %arg1: memref<32x32xf32, #tpu.memory_space<vmem>>, %arg2: memref<16x128xf32, #tpu.memory_space<vmem>>, %arg3: memref<32x128xf32, #tpu.memory_space<vmem>>) attributes {dimension_semantics = [#tpu.dimension_semantics<parallel>], iteration_bounds = array<i64: 2>, scalar_prefetch = 0 : i64, scratch_operands = 0 : i64, tpu.core_type = #tpu.core_type<tc>, window_params = [{transform_indices = @transform_0, window_bounds = array<i64: 32, 32>}, {pipeline_mode = #tpu.pipeline_mode<synchronous>, transform_indices = @transform_1, window_bounds = array<i64: 16, 128>}, {transform_indices = @transform_2, window_bounds = array<i64: 32, 128>}]} {
    %c0 = arith.constant 0 : index
    %c0_0 = arith.constant 0 : index
    %0 = vector.load %arg1[%c0, %c0_0] : memref<32x32xf32, #tpu.memory_space<vmem>>, vector<32x32xf32>
    %1 = vector.extract_strided_slice %0 {offsets = [0, 0], sizes = [32, 16], strides = [1, 1]} : vector<32x32xf32> to vector<32x16xf32>
    %2 = vector.extract_strided_slice %0 {offsets = [0, 16], sizes = [32, 16], strides = [1, 1]} : vector<32x32xf32> to vector<32x16xf32>
    %3 = arith.addf %1, %2 : vector<32x16xf32>
    %c0_1 = arith.constant 0 : index
    %c0_2 = arith.constant 0 : index
    %4 = vector.load %arg2[%c0_1, %c0_2] : memref<16x128xf32, #tpu.memory_space<vmem>>, vector<16x128xf32>
    %cst = arith.constant dense<0.000000e+00> : vector<32x128xf32>
    %5 = tpu.matmul %3, %4, %cst {dimension_numbers = #tpu.dot_dimension_numbers<[1], [0], [0], [1], [0, 0, 1, 1], [], []>} : vector<32x16xf32>, vector<16x128xf32>, vector<32x128xf32> -> vector<32x128xf32>
    %c0_3 = arith.constant 0 : index
    %c0_4 = arith.constant 0 : index
    %6 = vector.load %arg3[%c0_3, %c0_4] : memref<32x128xf32, #tpu.memory_space<vmem>>, vector<32x128xf32>
    tpu.vector_store %arg3[%c0_3, %c0_4], %5 {strides = array<i32>} : memref<32x128xf32, #tpu.memory_space<vmem>>, vector<32x128xf32>,
    return
  }
  func.func @transform_0(%arg0: i32) -> (i32, i32) {
    %c0_i32 = arith.constant 0 : i32
    %c0_i32_0 = arith.constant 0 : i32
    return %arg0, %c0_i32 : i32, i32
  }
  func.func @transform_1(%arg0: i32) -> (i32, i32) {
    %c0_i32 = arith.constant 0 : i32
    %c0_i32_0 = arith.constant 0 : i32
    %c0_i32_1 = arith.constant 0 : i32
    return %c0_i32, %c0_i32_0 : i32, i32
  }
  func.func @transform_2(%arg0: i32) -> (i32, i32) {
    %c0_i32 = arith.constant 0 : i32
    %c0_i32_0 = arith.constant 0 : i32
    return %arg0, %c0_i32 : i32, i32
  }
}

</mosaic_0001>

<bundles_post_ra>
// kernel: tpu_custom_call.1
= control target key start
LH: loop header
LB: loop body
LE: loop exit
PB: predicated region body
PF: predicated region fallthrough
CT: control target
= control target key end

     0   :  { %7 = vsyncpa [#allocation3], 0  ;;  %s532_s0 = inlined_call_operand.vmem [shape: f32[64,32], index: 0, kind: input, shape index: {}]   ;;  %s533_s1 = inlined_call_operand.vmem [shape: f32[16,128], index: 1, kind: input, shape index: {}]   ;;  %s534_s2 = inlined_call_operand.hbm [shape: f32[64,128], index: 2, kind: output, shape index: {}]  }
   0x1   :  { %9 = vsyncpa [#allocation3 + $0x1], 0  ;;  %s442_s9 = smov 0   ;;  %s444_s10 = smov 0  }
   0x2   :  { %s446_s11 = smov 0   ;;  %s448_s12 = smov 0  }
   0x3 LB: > { %s463_s13 = sadd.s32 4294967295, %s422_s12   ;;  %s295_s14 = sadd.s32 4294967294, %s422_s12   ;;  %s422_s12 = sphi %s448_s12, %s540_s12   ;;  %s418_s11 = sphi %s446_s11, %s539_s11   ;;  %s414_s10 = sphi %s444_s10, %s538_s10   ;;  %s410_s9 = sphi %s442_s9, %s537_s9  }
   0x4   : > { %s467_s15 = sadd.s32 1, %s422_s12   ;;  %s69_s16 = sadd.s32 1, %s418_s11 }
   0x5   : > { %s66_s17 = ssub.s32 %s422_s12, %s467_s15  ;;  %p79_p0 = scmp.ne.s32.totalorder %s418_s11, %s414_s10 }
   0x6   : > { %p67_p1 = scmp.eq.s32.totalorder %s66_s17, 0  ;;  %p80_p2 = scmp.eq.s32.totalorder %s463_s13, 1 }
   0x7   : > { %p85_p3 = scmp.ne.s32.totalorder %s414_s10, %s410_s9  ;;  %p86_p4 = scmp.eq.s32.totalorder %s295_s14, 1 }
   0x8   : > { %s478_s18 = scalar_select %p67_p1, %s418_s11, %s69_s16  }
   0x9   : > { %p480_p5 = por %p80_p2, %p79_p0  ;;  %p484_p6 = por %p86_p4, %p85_p3 }
   0xa   : > { %p298_p7 = scmp.ge.s32.totalorder %s422_s12, 1  ;;  %p116_p8 = scmp.lt.s32.totalorder %s422_s12, 3 }
   0xc   : > { %p117_p9 = pnand %p298_p7, %p116_p8 }
   0xd   : > { %s300_s21 = sshll.u32 (!%p117_p9), %s463_s13, 2  ;;  %s424_s28 = smov (!%p117_p9), 112  }
   0xe   : > { %120 = sbr.rel (%p117_p9) target bundleno = 284 (0x11c), region = 28  ;;  %p139_p10 = scmp.lt.s32.totalorder (!%p117_p9), %s300_s21, 7 }
   0xf   : > { %s135_s3 = sand.u32 (!%p117_p9), 1, %s414_s10   ;;  %s311_s6 = sshll.u32 (!%p117_p9), %s463_s13, 5 }
  0x10   : > { %s299_s4 = sshll.u32 (!%p117_p9), %s135_s3, 5  ;;  %s229_s14 = scalar_lea.hbm (!%p117_p9), %s534_s2, %s311_s6 }
  0x11   : > { %s137_s5 = scalar_lea.vmem (!%p117_p9), [#allocation2], %s299_s4  ;;  %s232_s17 = sshll.u32 (!%p117_p9), %s229_s14, 4  ;;  %s233_s17 = int_to_ptr.hbm [resolvable:$true] %s232_s17 }
  0x12   : > { %s230_s16 = sshll.u32 (!%p117_p9), %s137_s5, 4  ;;  %s374_s22 = sshra.s32 (!%p117_p9), %s233_s17, 4  ;;  %s231_s16 = int_to_ptr.vmem [resolvable:$true] %s230_s16  ;;  %s375_s22 = int_to_ptr.hbm [resolvable:$true] %s374_s22 }
  0x13   : > { %v170_v0 = vld [vmem:[%s533_s1 + $0x8] sm:$0xff]  ;;  %s542_s21 = smov (!%p139_p10, %s300_s21), 7  ;;  %v169_v5 = vld [vmem:[%s533_s1] sm:$0xff]  ;;  %vm171_vm0 = vcmask 130048   ;;  %s376_s23 = scalar_lea.hbm %s375_s22, 32 }
  0x14   : > { %313 = vmatpush.msra.mxu2 %v170_v0  ;;  %198 = vmatpush.msra.mxu0 %v170_v0  ;;  %s301_s24 = sshll.u32 %s542_s21, 3  ;;  %s218_s21 = scalar_lea.sflag [#allocation3], %s135_s3 }
  0x15   : > { %314 = vmatpush.msra.mxu3 %v170_v0  ;;  %312 = vmatpush.msra.mxu1 %v170_v0  ;;  %s142_s27 = scalar_lea.vmem %s532_s0, %s301_s24  ;;  %p377_p11 = scmp.ne.s32.totalorder %s375_s22, %s376_s23 }
  0x16   : > { %v147_v1 = vld [vmem:[%s142_s27 + $0x10] sm:$0xff]  ;;  %v145_v2 = vld [vmem:[%s142_s27] sm:$0xff]  ;;  %v148_v3 = vld [vmem:[%s142_s27 + $0x18] sm:$0xff]  ;;  %316 = vmatpush.msra.mxu2 %v169_v5  ;;  %199 = vmatpush.msra.mxu0 %v169_v5  ;;  %s380_s25 = scalar_lea.hbm %s534_s2, 64  ;;  %p381_p0 = scmp.lt.s32.totalorder %s375_s22, %s534_s2 }
  0x17   : > { %157 = vrot.lane.b32.xlu0 %v147_v1, %s424_s28  ;;  %153 = vrot.lane.b32.xlu1 %v145_v2, %s424_s28  ;;  %v146_v4 = vld [vmem:[%s142_s27 + $0x8] sm:$0xff]  ;;  %p378_p12 = pnand %p377_p11, %p480_p5  ;;  %p382_p1 = scmp.lt.s32.totalorder %s380_s25, %s376_s23 }
  0x18   : > { %317 = vmatpush.msra.mxu3 %v169_v5  ;;  %315 = vmatpush.msra.mxu1 %v169_v5 }
  0x19   : > { %p379_p13 = pneg %p378_p12  ;;  %p383_p2 = por %p382_p1, %p381_p0 }
  0x1b   : > { %p384_p3 = pnand %p383_p2, %p379_p13 }
  0x1f   : > { %159 = vrot.lane.b32.xlu0 %v148_v3, %s424_s28  ;;  %155 = vrot.lane.b32.xlu1 %v146_v4, %s424_s28 }
  0x89   : > { %v158_v6 = vpop.permute.xlu0 %157  ;;  %v154_v7 = vpop.permute.xlu1 %153 }
  0x8a   : > { %v167_v8 = vadd.f32 %v158_v6, %v147_v1  ;;  %v165_v9 = vadd.f32 %v154_v7, %v145_v2 }
  0x8c   : > { %304 = vmatmul.msk.f32.vlgmr.msra.gmra.mxu2 %vm171_vm0, %v167_v8  ;;  %302 = vmatmul.msk.f32.vlgmr.msra.gmra.mxu0 %vm171_vm0, %v165_v9 }
  0x91   : > { %v160_v10 = vpop.permute.xlu0 %159  ;;  %v156_v11 = vpop.permute.xlu1 %155 }
  0x92   : > { %v168_v12 = vadd.f32 %v160_v10, %v148_v3  ;;  %v166_v13 = vadd.f32 %v156_v11, %v146_v4 }
  0x94   : > { %305 = vmatmul.msk.f32.vlgmr.msra.gmra.mxu3 %vm171_vm0, %v168_v12  ;;  %303 = vmatmul.msk.f32.vlgmr.msra.gmra.mxu1 %vm171_vm0, %v166_v13 }
 0x109   : > { %v201_v14 = vpop.f32.mrf.mxu0 }
 0x10a   : > { %213 = vst [vmem:[%s137_s5] sm:$0xff] %v201_v14 }
 0x10f   : > { %v207_v15 = vpop.f32.mrf.mxu2 }
 0x110   : > { %215 = vst [vmem:[%s137_s5 + $0x10] sm:$0xff] %v207_v15 }
 0x111   : > { %v204_v16 = vpop.f32.mrf.mxu1 }
 0x112   : > { %214 = vst [vmem:[%s137_s5 + $0x8] sm:$0xff] %v204_v16 }
 0x117   : > { %v210_v17 = vpop.f32.mrf.mxu3 }
 0x118   : > { %216 = vst [vmem:[%s137_s5 + $0x18] sm:$0xff] %v210_v17 }
 0x119   : > { %387 = shalt.err (!%p384_p3)
}
 0x11a   : > { %s425_s28 = smov 128   ;;  %s426_s29 = smov 8  }
 0x11b   : > { %318 = dma.vmem_to_hbm [thread:$0]  (%p480_p5), %s231_s16, 512, %s233_s17, %s218_s21, %s425_s28, %s425_s28, %s426_s29  }
 0x11c PF: > { %p324_p4 = scmp.ge.s32.totalorder %s422_s12, 2  ;;  %s247_s30 = sand.u32 1, %s410_s9  }
 0x11d   : > { %s248_s3 = scalar_lea.sflag [#allocation3], %s247_s30 }
 0x11e   : > { %p321_p7 = pnand %p324_p4, %p484_p6 }
 0x120   : > { %p322_p8 = pneg %p321_p7 }
 0x122   : > { %405 = dma.done.wait (%p322_p8), %s248_s3, 512  }
 0x123   : > { %407 = vsyncadd (%p322_p8), %s248_s3, 4294966784  ;;  %p12_p9 = scmp.ge.s32.totalorder %s467_s15, 4   ;;  %s537_s9 = smov %s414_s10 }
 0x124   : > { %s538_s10 = smov %s418_s11  ;;  %s539_s11 = smov %s478_s18 }
 0x125   : > { %s540_s12 = smov %s467_s15  ;;  %14 = sbr.rel (!%p12_p9) target bundleno = 3 (0x3), region = 63 }
 0x12a   :  { %254 = vsyncpa [#allocation3], 1 }
 0x12b   :  { %256 = vsyncpa [#allocation3 + $0x1], 1 }

</bundles_post_ra>
